<compile_context>
chip_gen: v7x
topology: tpu7x:2x2x1
jax: 0.10.0
libtpu: 0.0.40
codegen_flags: <defaults>
</compile_context>

<pallas_src>
import functools

import jax
import jax.numpy as jnp
from jax.experimental import pallas as pl
from jax.experimental.pallas import tpu as pltpu

EPS = 1e-5


# ----------------------------------------------------------------------------
# small static helpers
# ----------------------------------------------------------------------------
def _round_up(v, m):
    return (v + m - 1) // m * m


def _pick_tile(dim, unit, cap):
    """Largest multiple of `unit` that divides `dim` and is <= cap."""
    best = unit
    t = unit
    while t <= min(cap, dim):
        if dim % t == 0:
            best = t
        t += unit
    return best


# ----------------------------------------------------------------------------
# Pallas kernels
# ----------------------------------------------------------------------------
def _conv_matmul_kernel(p_ref, w_ref, y_ref, s_ref, acc_ref):
    """Tiled bf16 matmul: f32 VMEM accumulator, bf16 writeback + f32 BN stats."""
    @pl.when(pl.program_id(2) == 0)
    def _():
        acc_ref[...] = jnp.zeros_like(acc_ref)

    acc_ref[...] += jnp.dot(p_ref[...], w_ref[...],
                            preferred_element_type=jnp.float32)

    @pl.when(pl.program_id(2) == pl.num_programs(2) - 1)
    def _():
        acc = acc_ref[...]
        y_ref[...] = acc.astype(y_ref.dtype)
        colsum = jnp.sum(acc, axis=0, keepdims=True)        # (1, TN)
        colsq = jnp.sum(acc * acc, axis=0, keepdims=True)   # (1, TN)
        s_ref[...] = jnp.concatenate([colsum, colsq], axis=0)[None]


@functools.lru_cache(maxsize=None)
def _make_bn_act_kernel(apply_relu, has_residual):
    """BN affine (+residual)(+ReLU) epilogue: bf16 in/out, f32 math inside."""
    def _body(y, scale, shift, r):
        out = y.astype(jnp.float32) * scale + shift
        if r is not None:
            out = out + r.astype(jnp.float32)
        if apply_relu:
            out = jnp.maximum(out, 0.0)
        return out

    if has_residual:
        def kernel(y_ref, s_ref, b_ref, r_ref, o_ref):
            o_ref[...] = _body(y_ref[...], s_ref[...], b_ref[...],
                               r_ref[...]).astype(o_ref.dtype)
    else:
        def kernel(y_ref, s_ref, b_ref, o_ref):
            o_ref[...] = _body(y_ref[...], s_ref[...], b_ref[...],
                               None).astype(o_ref.dtype)
    return kernel


def _maxpool_kernel(p_ref, o_ref):
    # p: [9, TH, CL] lane-dense window-shifted copies -> max over the 9 taps
    o_ref[...] = jnp.max(p_ref[...], axis=0)


def _avgpool_kernel(x_ref, o_ref):
    # x: [1, H*W, C] (one image) -> global average pool -> [1, 1, C] f32
    o_ref[...] = jnp.mean(x_ref[...].astype(jnp.float32), axis=1,
                          keepdims=True)


def _fc_kernel(x_ref, w_ref, b_ref, o_ref):
    o_ref[...] = jnp.dot(x_ref[...], w_ref[...],
                         preferred_element_type=jnp.float32) + b_ref[...]


# ----------------------------------------------------------------------------
# cached pallas_call builders (one Mosaic compile per unique shape config)
# ----------------------------------------------------------------------------
@functools.lru_cache(maxsize=None)
def _build_conv_matmul(Mp, Kp, Np, TM, TK, TN):
    nm, nn, nk = Mp // TM, Np // TN, Kp // TK
    fn = pl.pallas_call(
        _conv_matmul_kernel,
        out_shape=(jax.ShapeDtypeStruct((Mp, Np), jnp.bfloat16),
                   jax.ShapeDtypeStruct((nm, 2, Np), jnp.float32)),
        grid=(nm, nn, nk),
        in_specs=[pl.BlockSpec((TM, TK), lambda i, j, k: (i, k)),
                  pl.BlockSpec((TK, TN), lambda i, j, k: (k, j))],
        out_specs=(pl.BlockSpec((TM, TN), lambda i, j, k: (i, j)),
                   pl.BlockSpec((1, 2, TN), lambda i, j, k: (i, 0, j))),
        scratch_shapes=[pltpu.VMEM((TM, TN), jnp.float32)],
        compiler_params=pltpu.CompilerParams(
            dimension_semantics=("parallel", "parallel", "arbitrary"),
            # bf16 blocks keep the double-buffered footprint ~5 MiB; this just
            # gives headroom above v5e's 16 MiB scoped default if tiles grow.
            vmem_limit_bytes=32 * 1024 * 1024),
    )
    return jax.jit(fn)


@functools.lru_cache(maxsize=None)
def _build_bn_act(Mp, Np, TM, TN, relu, has_residual):
    kernel = _make_bn_act_kernel(relu, has_residual)
    in_specs = [pl.BlockSpec((TM, TN), lambda i, j: (i, j)),
                pl.BlockSpec((1, TN), lambda i, j: (0, j)),
                pl.BlockSpec((1, TN), lambda i, j: (0, j))]
    if has_residual:
        in_specs.append(pl.BlockSpec((TM, TN), lambda i, j: (i, j)))
    fn = pl.pallas_call(
        kernel,
        out_shape=jax.ShapeDtypeStruct((Mp, Np), jnp.bfloat16),
        grid=(Mp // TM, Np // TN),
        in_specs=in_specs,
        out_specs=pl.BlockSpec((TM, TN), lambda i, j: (i, j)),
        compiler_params=pltpu.CompilerParams(
            dimension_semantics=("parallel", "parallel")),
    )
    return jax.jit(fn)


@functools.lru_cache(maxsize=None)
def _build_maxpool(Hp, CL, TH):
    fn = pl.pallas_call(
        _maxpool_kernel,
        out_shape=jax.ShapeDtypeStruct((Hp, CL), jnp.bfloat16),
        grid=(Hp // TH,),
        in_specs=[pl.BlockSpec((9, TH, CL), lambda i: (0, i, 0))],
        out_specs=pl.BlockSpec((TH, CL), lambda i: (i, 0)),
        compiler_params=pltpu.CompilerParams(
            dimension_semantics=("parallel",)),
    )
    return jax.jit(fn)


@functools.lru_cache(maxsize=None)
def _build_avgpool(N, HW, C):
    fn = pl.pallas_call(
        _avgpool_kernel,
        out_shape=jax.ShapeDtypeStruct((N, 1, C), jnp.float32),
        grid=(N,),
        in_specs=[pl.BlockSpec((1, HW, C), lambda i: (i, 0, 0))],
        out_specs=pl.BlockSpec((1, 1, C), lambda i: (i, 0, 0)),
        compiler_params=pltpu.CompilerParams(
            dimension_semantics=("parallel",)),
    )
    return jax.jit(fn)


@functools.lru_cache(maxsize=None)
def _build_fc(N, Kd, NP):
    fn = pl.pallas_call(
        _fc_kernel,
        out_shape=jax.ShapeDtypeStruct((N, NP), jnp.float32),
        grid=(1,),
        in_specs=[pl.BlockSpec((N, Kd), lambda i: (0, 0)),
                  pl.BlockSpec((Kd, NP), lambda i: (0, 0)),
                  pl.BlockSpec((1, NP), lambda i: (0, 0))],
        out_specs=pl.BlockSpec((N, NP), lambda i: (0, 0)),
        compiler_params=pltpu.CompilerParams(
            dimension_semantics=("arbitrary",)),
    )
    return jax.jit(fn)


# ----------------------------------------------------------------------------
# Plain-JAX glue: im2col patch extraction (bf16 patches)
# ----------------------------------------------------------------------------
def _im2col(x, k, stride, padding):
    """x: [N, H, W, C] NHWC -> bf16 patches [N*OH*OW, k*k*C] (kh, kw, c)."""
    N, H, W, C = x.shape
    x = x.astype(jnp.bfloat16)
    xp = jnp.pad(x, ((0, 0), (padding, padding), (padding, padding), (0, 0)))
    OH = (H + 2 * padding - k) // stride + 1
    OW = (W + 2 * padding - k) // stride + 1
    cols = []
    for kh in range(k):
        for kw in range(k):
            cols.append(xp[:, kh:kh + stride * OH:stride,
                           kw:kw + stride * OW:stride, :])
    patches = jnp.concatenate(cols, axis=-1)          # [N, OH, OW, k*k*C]
    return patches.reshape(N * OH * OW, k * k * C), (N, OH, OW)


# ----------------------------------------------------------------------------
# Fused conv + BN (+residual) (+ReLU) wrapper: tiled matmul + tiled epilogue
# ----------------------------------------------------------------------------
def conv_bn(x, prep, *, stride, padding, relu, residual=None):
    ksz, cout = prep["ksz"], prep["cout"]
    Kp, Np = prep["Kp"], prep["Np"]
    patches, (N, OH, OW) = _im2col(x, ksz, stride, padding)
    M, K = patches.shape

    # Tile selection: M/N tiles are multiples of 256 so each jnp.dot maps onto
    # full 256x256 MXU passes (v6e/v7x); rows are zero-padded up to the tile so
    # TM never degrades for awkward M.  Zero rows/cols are neutral for the
    # matmul, the BN statistics (divided by true M) and the epilogue.
    TM = min(512, _round_up(M, 256))
    Mp = _round_up(M, TM)
    TK = _pick_tile(Kp, 128, 512)
    TN = min(512, Np)
    if Np % TN:
        TN = _pick_tile(Np, 128, 512)
    # v7x megacore: keep >=2 parallel blocks so both TensorCores get work.
    if (Mp // TM) * (Np // TN) < 2 and Np >= 256:
        TN = Np // 2

    p = jnp.pad(patches, ((0, Mp - M), (0, Kp - K)))
    y, stats = _build_conv_matmul(Mp, Kp, Np, TM, TK, TN)(p, prep["wm"])

    # BatchNorm2d batch statistics (train mode, biased variance) in f32,
    # exact because they come from the f32 accumulator partials.
    sums = jnp.sum(stats, axis=0)                     # (2, Np)
    mean = sums[0] / M
    var = jnp.maximum(sums[1] / M - mean * mean, 0.0)
    inv = jax.lax.rsqrt(var + EPS)
    scale = (prep["g"] * inv).reshape(1, Np)
    shift = (prep["b"] - mean * prep["g"] * inv).reshape(1, Np)

    args = [y, scale, shift]
    if residual is not None:
        r = jnp.pad(residual.reshape(M, cout).astype(jnp.bfloat16),
                    ((0, Mp - M), (0, Np - cout)))
        args.append(r)

    out = _build_bn_act(Mp, Np, TM, TN, relu, residual is not None)(*args)
    return out[:M, :cout].reshape(N, OH, OW, cout)


def max_pool_3x3_s2(x):
    N, H, W, C = x.shape
    k, s, pad = 3, 2, 1
    xp = jnp.pad(x.astype(jnp.bfloat16),
                 ((0, 0), (pad, pad), (pad, pad), (0, 0)),
                 constant_values=-jnp.inf)
    OH = (H + 2 * pad - k) // s + 1
    OW = (W + 2 * pad - k) // s + 1
    M = N * OH * OW
    wins = [xp[:, kh:kh + s * OH:s, kw:kw + s * OW:s, :].reshape(M, C)
            for kh in range(k) for kw in range(k)]
    stack = jnp.stack(wins, axis=0)                    # (9, M, C) bf16
    # Lane-densify: fold pairs of rows into the lane dim (C=64 -> 128 lanes)
    # so every load/store is a full-width vreg; tap-max is elementwise so the
    # fold is semantics-preserving.
    fold = 128 // C if (C < 128 and 128 % C == 0) else 1
    rows = -(-M // fold)
    TH = min(512, _round_up(rows, 16))
    Hp = _round_up(rows, TH)
    Mp = Hp * fold
    stack = jnp.pad(stack, ((0, 0), (0, Mp - M), (0, 0)))
    stack = stack.reshape(9, Hp, fold * C)
    out = _build_maxpool(Hp, fold * C, TH)(stack)
    return out.reshape(Mp, C)[:M].reshape(N, OH, OW, C)


# ----------------------------------------------------------------------------
# One-time parameter preprocessing (hoisted weight reshape/cast/pad)
# ----------------------------------------------------------------------------
def _prep_conv(w, gamma, beta):
    ksz, _, cin, cout = w.shape
    K = ksz * ksz * cin
    Kp = _round_up(K, 128)
    Np = _round_up(cout, 128)
    wm = jnp.pad(w.reshape(K, cout).astype(jnp.bfloat16),
                 ((0, Kp - K), (0, Np - cout)))
    g = jnp.pad(gamma.astype(jnp.float32), (0, Np - cout))
    b = jnp.pad(beta.astype(jnp.float32), (0, Np - cout))
    return {"wm": wm, "g": g, "b": b,
            "ksz": ksz, "cout": cout, "Kp": Kp, "Np": Np}


def preprocess_params(params):
    prep = {"conv1": _prep_conv(params["conv1_w"], params["bn1_g"],
                                params["bn1_b"]),
            "stages": []}
    for stage in params["stages"]:
        blocks = []
        for blk in stage:
            pb = {"stride": blk["stride"],
                  "conv1": _prep_conv(blk["conv1_w"], blk["bn1_g"],
                                      blk["bn1_b"]),
                  "conv2": _prep_conv(blk["conv2_w"], blk["bn2_g"],
                                      blk["bn2_b"])}
            if "ds_w" in blk:
                pb["ds"] = _prep_conv(blk["ds_w"], blk["ds_g"], blk["ds_b"])
            blocks.append(pb)
        prep["stages"].append(blocks)
    NOUT = params["fc_w"].shape[1]
    NP = _round_up(NOUT, 128)
    prep["fc_w"] = jnp.pad(params["fc_w"].astype(jnp.bfloat16),
                           ((0, 0), (0, NP - NOUT)))
    prep["fc_b"] = jnp.pad(params["fc_b"].reshape(1, NOUT).astype(jnp.float32),
                           ((0, 0), (0, NP - NOUT)))
    prep["fc_nout"] = NOUT
    return prep


# ----------------------------------------------------------------------------
# ResNet-34 structure
# ----------------------------------------------------------------------------
def basic_block(x, blk):
    stride = blk["stride"]
    out = conv_bn(x, blk["conv1"], stride=stride, padding=1, relu=True)
    if "ds" in blk:
        identity = conv_bn(x, blk["ds"], stride=stride, padding=0, relu=False)
    else:
        identity = x
    out = conv_bn(out, blk["conv2"], stride=1, padding=1, relu=True,
                  residual=identity)
    return out


def resnet34_forward(prep, x_nchw):
    x = jnp.transpose(x_nchw, (0, 2, 3, 1)).astype(jnp.float32)  # NCHW->NHWC
    x = conv_bn(x, prep["conv1"], stride=2, padding=3, relu=True)
    x = max_pool_3x3_s2(x)
    for stage in prep["stages"]:
        for blk in stage:
            x = basic_block(x, blk)

    # adaptive avg pool to (1, 1), tiled over the batch
    N, H, W, C = x.shape
    feat = _build_avgpool(N, H * W, C)(x.reshape(N, H * W, C))   # (N,1,C) f32
    feat = feat.reshape(N, C)

    # fc: [N, 512] @ [512, 1000] + bias, padded to 1024 lanes (dense stores)
    NOUT = prep["fc_nout"]
    Kd, NP = prep["fc_w"].shape
    logits = _build_fc(N, Kd, NP)(feat.astype(jnp.bfloat16),
                                  prep["fc_w"], prep["fc_b"])
    return logits[:, :NOUT]


# ----------------------------------------------------------------------------
# Deterministic parameter init (synthetic, matches PyTorch module shapes)
# ----------------------------------------------------------------------------
def init_params(key):
    def conv_w(k_, ksz, cin, cout):
        std = (2.0 / (ksz * ksz * cin)) ** 0.5
        return jax.random.normal(k_, (ksz, ksz, cin, cout), jnp.float32) * std

    keys = iter(jax.random.split(key, 128))
    params = {
        "conv1_w": conv_w(next(keys), 7, 3, 64),
        "bn1_g": jnp.ones((64,), jnp.float32),
        "bn1_b": jnp.zeros((64,), jnp.float32),
    }

    # (in_channels, out_channels, num_blocks, downsample_in_first_block)
    stage_cfg = [(64, 64, 3, False), (64, 128, 4, True),
                 (128, 256, 6, True), (256, 512, 3, True)]
    stages = []
    for cin, cout, nblocks, downsample in stage_cfg:
        blocks = []
        for bi in range(nblocks):
            first = bi == 0
            b_cin = cin if first else cout
            stride = 2 if (first and downsample) else 1
            blk = {
                "stride": stride,
                "conv1_w": conv_w(next(keys), 3, b_cin, cout),
                "bn1_g": jnp.ones((cout,), jnp.float32),
                "bn1_b": jnp.zeros((cout,), jnp.float32),
                "conv2_w": conv_w(next(keys), 3, cout, cout),
                "bn2_g": jnp.ones((cout,), jnp.float32),
                "bn2_b": jnp.zeros((cout,), jnp.float32),
            }
            if first and downsample:
                blk["ds_w"] = conv_w(next(keys), 1, b_cin, cout)
                blk["ds_g"] = jnp.ones((cout,), jnp.float32)
                blk["ds_b"] = jnp.zeros((cout,), jnp.float32)
            blocks.append(blk)
        stages.append(blocks)
    params["stages"] = stages

    fc_std = (1.0 / 512.0) ** 0.5
    params["fc_w"] = jax.random.uniform(next(keys), (512, 1000), jnp.float32,
                                        -fc_std, fc_std)
    params["fc_b"] = jax.random.uniform(next(keys), (1, 1000), jnp.float32,
                                        -fc_std, fc_std)
    return params


# ----------------------------------------------------------------------------
if __name__ == "__main__":
    # Small but consistent shape: NCHW, 3 input channels as conv1 requires.
    x = jax.random.normal(jax.random.PRNGKey(0), (2, 3, 16, 16), jnp.float32)
    params = init_params(jax.random.PRNGKey(42))
    prep = preprocess_params(params)

    logits = resnet34_forward(prep, x)
    logits = jax.block_until_ready(logits)

    assert logits.shape == (2, 1000), logits.shape
    assert bool(jnp.all(jnp.isfinite(logits)))
    print("KERNEL_OK")
</pallas_src>

<mosaic_0001>
module attributes {stable_mosaic.version = 11 : i64} {
  func.func @_conv_matmul_kernel(%arg0: i32, %arg1: i32, %arg2: i32, %arg3: memref<256x256xbf16, #tpu.memory_space<vmem>>, %arg4: memref<256x128xbf16, #tpu.memory_space<vmem>>, %arg5: memref<256x128xbf16, #tpu.memory_space<vmem>>, %arg6: memref<1x2x128xf32, #tpu.memory_space<vmem>>, %arg7: memref<256x128xf32, #tpu.memory_space<vmem>>) attributes {dimension_semantics = [#tpu.dimension_semantics<parallel>, #tpu.dimension_semantics<parallel>, #tpu.dimension_semantics<arbitrary>], iteration_bounds = array<i64: 1, 1, 1>, scalar_prefetch = 0 : i64, scratch_operands = 1 : i64, tpu.core_type = #tpu.core_type<tc>, window_params = [{transform_indices = @transform_0, window_bounds = array<i64: 256, 256>}, {transform_indices = @transform_1, window_bounds = array<i64: 256, 128>}, {transform_indices = @transform_2, window_bounds = array<i64: 256, 128>}, {transform_indices = @transform_3, window_bounds = array<i64: 1, 2, 128>}]} {
    %c0_i32 = arith.constant 0 : i32
    %0 = arith.cmpi eq, %arg2, %c0_i32 : i32
    %1 = arith.extui %0 : i1 to i32
    %c0_i32_0 = arith.constant 0 : i32
    %2 = arith.cmpi ne, %1, %c0_i32_0 : i32
    scf.if %2 {
      %cst_10 = arith.constant 0.000000e+00 : f32
      %12 = vector.broadcast %cst_10 : f32 to vector<256x128xf32>
      %c0_11 = arith.constant 0 : index
      %c0_12 = arith.constant 0 : index
      %13 = vector.load %arg7[%c0_11, %c0_12] : memref<256x128xf32, #tpu.memory_space<vmem>>, vector<256x128xf32>
      tpu.vector_store %arg7[%c0_11, %c0_12], %12 {strides = array<i32>} : memref<256x128xf32, #tpu.memory_space<vmem>>, vector<256x128xf32>,
    } else {
    }
    %c0 = arith.constant 0 : index
    %c0_1 = arith.constant 0 : index
    %3 = vector.load %arg7[%c0, %c0_1] : memref<256x128xf32, #tpu.memory_space<vmem>>, vector<256x128xf32>
    %c0_2 = arith.constant 0 : index
    %c0_3 = arith.constant 0 : index
    %4 = vector.load %arg3[%c0_2, %c0_3] : memref<256x256xbf16, #tpu.memory_space<vmem>>, vector<256x256xbf16>
    %c0_4 = arith.constant 0 : index
    %c0_5 = arith.constant 0 : index
    %5 = vector.load %arg4[%c0_4, %c0_5] : memref<256x128xbf16, #tpu.memory_space<vmem>>, vector<256x128xbf16>
    %cst = arith.constant dense<0.000000e+00> : vector<256x128xf32>
    %6 = tpu.matmul %4, %5, %cst {dimension_numbers = #tpu.dot_dimension_numbers<[1], [0], [0], [1], [0, 0, 1, 1], [], []>} : vector<256x256xbf16>, vector<256x128xbf16>, vector<256x128xf32> -> vector<256x128xf32>
    %7 = arith.addf %3, %6 : vector<256x128xf32>
    %c0_6 = arith.constant 0 : index
    %c0_7 = arith.constant 0 : index
    %8 = vector.load %arg7[%c0_6, %c0_7] : memref<256x128xf32, #tpu.memory_space<vmem>>, vector<256x128xf32>
    tpu.vector_store %arg7[%c0_6, %c0_7], %7 {strides = array<i32>} : memref<256x128xf32, #tpu.memory_space<vmem>>, vector<256x128xf32>,
    %c0_i32_8 = arith.constant 0 : i32
    %9 = arith.cmpi eq, %arg2, %c0_i32_8 : i32
    %10 = arith.extui %9 : i1 to i32
    %c0_i32_9 = arith.constant 0 : i32
    %11 = arith.cmpi ne, %10, %c0_i32_9 : i32
    scf.if %11 {
      %c0_10 = arith.constant 0 : index
      %c0_11 = arith.constant 0 : index
      %12 = vector.load %arg7[%c0_10, %c0_11] : memref<256x128xf32, #tpu.memory_space<vmem>>, vector<256x128xf32>
      %13 = arith.truncf %12 : vector<256x128xf32> to vector<256x128xbf16>
      %c0_12 = arith.constant 0 : index
      %c0_13 = arith.constant 0 : index
      %14 = vector.load %arg5[%c0_12, %c0_13] : memref<256x128xbf16, #tpu.memory_space<vmem>>, vector<256x128xbf16>
      tpu.vector_store %arg5[%c0_12, %c0_13], %13 {strides = array<i32>} : memref<256x128xbf16, #tpu.memory_space<vmem>>, vector<256x128xbf16>,
      %cst_14 = arith.constant dense<0.000000e+00> : vector<128xf32>
      %15 = vector.multi_reduction <add>, %12, %cst_14 [0] : vector<256x128xf32> to vector<128xf32>
      %16 = vector.shape_cast %15 : vector<128xf32> to vector<1x128xf32>
      %17 = arith.mulf %12, %12 : vector<256x128xf32>
      %cst_15 = arith.constant dense<0.000000e+00> : vector<128xf32>
      %18 = vector.multi_reduction <add>, %17, %cst_15 [0] : vector<256x128xf32> to vector<128xf32>
      %19 = vector.shape_cast %18 : vector<128xf32> to vector<1x128xf32>
      %20 = tpu.concatenate %16, %19 in 0 : vector<1x128xf32>, vector<1x128xf32> -> vector<2x128xf32>
      %21 = vector.shape_cast %20 : vector<2x128xf32> to vector<1x2x128xf32>
      %c0_16 = arith.constant 0 : index
      %c0_17 = arith.constant 0 : index
      %c0_18 = arith.constant 0 : index
      %22 = vector.load %arg6[%c0_16, %c0_17, %c0_18] : memref<1x2x128xf32, #tpu.memory_space<vmem>>, vector<1x2x128xf32>
      tpu.vector_store %arg6[%c0_16, %c0_17, %c0_18], %21 {strides = array<i32>} : memref<1x2x128xf32, #tpu.memory_space<vmem>>, vector<1x2x128xf32>,
    } else {
    }
    return
  }
  func.func @transform_0(%arg0: i32, %arg1: i32, %arg2: i32) -> (i32, i32) {
    %c0_i32 = arith.constant 0 : i32
    return %arg0, %arg2 : i32, i32
  }
  func.func @transform_1(%arg0: i32, %arg1: i32, %arg2: i32) -> (i32, i32) {
    %c0_i32 = arith.constant 0 : i32
    return %arg2, %arg1 : i32, i32
  }
  func.func @transform_2(%arg0: i32, %arg1: i32, %arg2: i32) -> (i32, i32) {
    %c0_i32 = arith.constant 0 : i32
    return %arg0, %arg1 : i32, i32
  }
  func.func @transform_3(%arg0: i32, %arg1: i32, %arg2: i32) -> (i32, i32, i32) {
    %c0_i32 = arith.constant 0 : i32
    %c0_i32_0 = arith.constant 0 : i32
    return %arg0, %c0_i32, %arg1 : i32, i32, i32
  }
}

</mosaic_0001>

<bundles_post_ra>
// kernel: tpu_custom_call.1
= control target key start
LH: loop header
LB: loop body
LE: loop exit
PB: predicated region body
PF: predicated region fallthrough
CT: control target
= control target key end

     0   :  { %9 = vsyncpa [#allocation4], 0  ;;  %s1674_s0 = inlined_call_operand.hbm [shape: bf16[256,256], index: 0, kind: input, shape index: {}]   ;;  %s1675_s1 = inlined_call_operand.hbm [shape: bf16[256,128], index: 1, kind: input, shape index: {}]   ;;  %s1676_s2 = inlined_call_operand.hbm [shape: bf16[256,128], index: 2, kind: output, shape index: {0}]   ;;  %s1677_s3 = inlined_call_operand.hbm [shape: f32[1,2,128], index: 3, kind: output, shape index: {1}]  }
   0x1   :  { %10 = vsyncpa [#allocation7], 0 }
   0x2   :  { %11 = vsyncpa [#allocation5], 0 }
   0x3   :  { %12 = vsyncpa [#allocation10], 0  ;;  %s1496_s12 = smov [#allocation3]   ;;  %s1400_s16 = scalar_lea.hbm %s1674_s0, 4096 }
   0x4   :  { %s18_s13 = sshll.u32 %s1496_s12, 4  ;;  %p1401_p0 = scmp.ne.s32.totalorder %s1674_s0, %s1400_s16  ;;  %s19_s13 = int_to_ptr.vmem [resolvable:$true] %s18_s13 }
   0x5   :  { %p1404_p1 = scmp.lt.u32.totalorder %s1400_s16, %s1674_s0 }
   0x7   :  { %p1406_p2 = pnand %p1404_p1, %p1401_p0 }
   0x9   :  { %1409 = shalt.err (!%p1406_p2)
}
   0xa   :  { %s1410_s21 = scalar_lea.vmem %s19_s13, 4096  ;;  %p1415_p4 = scmp.lt.s32.totalorder %s19_s13, %s19_s13 }
   0xb   :  { %p1411_p3 = scmp.ne.s32.totalorder %s19_s13, %s1410_s21  ;;  %p1416_p5 = scmp.lt.s32.totalorder %s1410_s21, %s1410_s21 }
   0xd   :  { %p1417_p6 = por %p1416_p5, %p1415_p4 }
   0xf   :  { %p1418_p7 = pnand %p1417_p6, %p1411_p3 }
  0x11   :  { %1421 = shalt.err (!%p1418_p7)
}
  0x12   :  { %s1497_s22 = smov 128   ;;  %s1498_s23 = smov 8  }
  0x13   :  { %24 = dma.hbm_to_vmem [thread:$0]  %s1674_s0, 4096, %s19_s13, [#allocation4], %s1497_s22, %s1497_s22, %s1498_s23  }
  0x14   :  { %s1499_s26 = smov [#allocation6]   ;;  %s1422_s30 = scalar_lea.hbm %s1675_s1, 2048 }
  0x15   :  { %s30_s27 = sshll.u32 %s1499_s26, 4  ;;  %p1423_p8 = scmp.ne.s32.totalorder %s1675_s1, %s1422_s30  ;;  %s31_s27 = int_to_ptr.vmem [resolvable:$true] %s30_s27 }
  0x16   :  { %p1426_p9 = scmp.lt.u32.totalorder %s1422_s30, %s1675_s1 }
  0x18   :  { %p1428_p10 = pnand %p1426_p9, %p1423_p8 }
  0x1a   :  { %1431 = shalt.err (!%p1428_p10)
}
  0x1b   :  { %s1432_s8 = scalar_lea.vmem %s31_s27, 2048  ;;  %p1437_p12 = scmp.lt.s32.totalorder %s31_s27, %s31_s27 }
  0x1c   :  { %p1433_p11 = scmp.ne.s32.totalorder %s31_s27, %s1432_s8  ;;  %p1438_p13 = scmp.lt.s32.totalorder %s1432_s8, %s1432_s8 }
  0x1e   :  { %p1439_p0 = por %p1438_p13, %p1437_p12 }
  0x20   :  { %p1440_p1 = pnand %p1439_p0, %p1433_p11 }
  0x22   :  { %1443 = shalt.err (!%p1440_p1)
}
  0x23   :  { %s1500_s0 = smov 64   ;;  %s1501_s9 = smov 4  }
  0x24   :  { %36 = dma.hbm_to_vmem [thread:$0]  %s1675_s1, 2048, %s31_s27, [#allocation7], %s1500_s0, %s1500_s0, %s1501_s9  }
  0x25   :  { %1488 = dma.done.wait [#allocation4], 4096  }
  0x26   :  { %1489 = vsyncadd [#allocation4], 4294963200 }
  0x27   :  { %1490 = dma.done.wait [#allocation7], 2048  }
  0x28   :  { %1491 = vsyncadd [#allocation7], 4294965248  ;;  %v1336_v0 = vld [vmem:[#allocation6 + $0x40] sm:$0xff]   ;;  %v1338_v2 = vld [vmem:[#allocation6 + $0x48] sm:$0xff]   ;;  %s1502_s1 = smov [#allocation8]  }
  0x29   :  { %v1337_v1 = vld [vmem:[#allocation6] sm:$0xff]   ;;  %1200 = vmatprep.subr.bf16.mxu0 %v1336_v0  ;;  %1312 = vmatprep.subr.bf16.mxu1 %v1336_v0  ;;  %v1339_v3 = vld [vmem:[#allocation6 + $0x8] sm:$0xff]   ;;  %v1340_v4 = vld [vmem:[#allocation6 + $0x50] sm:$0xff]   ;;  %s966_s12 = sshll.u32 %s1502_s1, 4  ;;  %s967_s12 = int_to_ptr.vmem [resolvable:$true] %s966_s12 }
  0x2a   :  { %1201 = vmatpush3.bf16.msra.mxu0 %v1337_v1  ;;  %1320 = vmatpush3.bf16.msra.mxu1 %v1337_v1  ;;  %v1341_v5 = vld [vmem:[#allocation6 + $0x10] sm:$0xff]   ;;  %v1342_v6 = vld [vmem:[#allocation6 + $0x58] sm:$0xff]   ;;  %v1344_v8 = vld [vmem:[#allocation6 + $0x60] sm:$0xff]   ;;  %s1444_s13 = scalar_lea.vmem %s967_s12, 2048  ;;  %p1449_p3 = scmp.lt.s32.totalorder %s967_s12, %s967_s12 }
  0x2b   :  { %1202 = vmatprep.subr.bf16.mxu0 %v1338_v2  ;;  %1313 = vmatprep.subr.bf16.mxu1 %v1338_v2  ;;  %v1343_v7 = vld [vmem:[#allocation6 + $0x18] sm:$0xff]   ;;  %v1345_v9 = vld [vmem:[#allocation6 + $0x20] sm:$0xff]   ;;  %v1346_v10 = vld [vmem:[#allocation6 + $0x68] sm:$0xff]   ;;  %p1445_p2 = scmp.ne.s32.totalorder %s967_s12, %s1444_s13  ;;  %p1450_p4 = scmp.lt.s32.totalorder %s1444_s13, %s1444_s13 }
  0x2c   :  { %v1354_v11 = vld [vmem:[#allocation3 + $0x4] ss:$8 sps:$4 sm:$0xff]   ;;  %v1348_v13 = vld [vmem:[#allocation6 + $0x70] sm:$0xff]   ;;  %v1350_v16 = vld [vmem:[#allocation6 + $0x78] sm:$0xff]  }
  0x2d   :  { %v1347_v12 = vld [vmem:[#allocation6 + $0x28] sm:$0xff]   ;;  %464 = vmatprep.mubr.bf16.mxu0 %v1354_v11  ;;  %v1349_v15 = vld [vmem:[#allocation6 + $0x30] sm:$0xff]   ;;  %v1351_v17 = vld [vmem:[#allocation6 + $0x38] sm:$0xff]   ;;  %p1451_p5 = por %p1450_p4, %p1449_p3 }
  0x2e   :  { %1203 = vmatpush3.bf16.msra.mxu0 %v1339_v3  ;;  %1321 = vmatpush3.bf16.msra.mxu1 %v1339_v3  ;;  %v1366_v14 = vld [vmem:[#allocation3 + $0x84] ss:$8 sps:$4 sm:$0xff]   ;;  %v1352_v18 = vld [vmem:[#allocation3] ss:$8 sps:$4 sm:$0xff]   ;;  %v1355_v19 = vld [vmem:[#allocation3 + $0x14] ss:$8 sps:$4 sm:$0xff]  }
  0x2f   :  { %1204 = vmatprep.subr.bf16.mxu0 %v1340_v4  ;;  %1314 = vmatprep.subr.bf16.mxu1 %v1340_v4  ;;  %v1364_v20 = vld [vmem:[#allocation3 + $0x80] ss:$8 sps:$4 sm:$0xff]   ;;  %v1370_v21 = vld [vmem:[#allocation3 + $0x94] ss:$8 sps:$4 sm:$0xff]   ;;  %v1357_v22 = vld [vmem:[#allocation3 + $0x10] ss:$8 sps:$4 sm:$0xff]   ;;  %p1452_p6 = pnand %p1451_p5, %p1445_p2 }
  0x30   :  { %528 = vmatprep.mubr.bf16.mxu1 %v1366_v14  ;;  %v1358_v23 = vld [vmem:[#allocation3 + $0x24] ss:$8 sps:$4 sm:$0xff]   ;;  %v1372_v24 = vld [vmem:[#allocation3 + $0x90] ss:$8 sps:$4 sm:$0xff]   ;;  %v1360_v26 = vld [vmem:[#allocation3 + $0x20] ss:$8 sps:$4 sm:$0xff]  }
  0x31   :  { %v1376_v25 = vld [vmem:[#allocation3 + $0xa4] ss:$8 sps:$4 sm:$0xff]   ;;  %v1361_v27 = vld [vmem:[#allocation3 + $0x34] ss:$8 sps:$4 sm:$0xff]   ;;  %v1378_v28 = vld [vmem:[#allocation3 + $0xa0] ss:$8 sps:$4 sm:$0xff]  }
  0x32   :  { %1205 = vmatpush3.bf16.msra.mxu0 %v1341_v5  ;;  %1322 = vmatpush3.bf16.msra.mxu1 %v1341_v5  ;;  %v1382_v29 = vld [vmem:[#allocation3 + $0xb4] ss:$8 sps:$4 sm:$0xff]   ;;  %v1363_v30 = vld [vmem:[#allocation3 + $0x30] ss:$8 sps:$4 sm:$0xff]   ;;  %v1367_v31 = vld [vmem:[#allocation3 + $0x44] ss:$8 sps:$4 sm:$0xff]  }
  0x33   :  { %1206 = vmatprep.subr.bf16.mxu0 %v1342_v6  ;;  %1315 = vmatprep.subr.bf16.mxu1 %v1342_v6  ;;  %v1384_v32 = vld [vmem:[#allocation3 + $0xb0] ss:$8 sps:$4 sm:$0xff]   ;;  %v1388_v33 = vld [vmem:[#allocation3 + $0xc4] ss:$8 sps:$4 sm:$0xff]   ;;  %v1369_v34 = vld [vmem:[#allocation3 + $0x40] ss:$8 sps:$4 sm:$0xff]  }
  0x34   :  { %v1373_v35 = vld [vmem:[#allocation3 + $0x54] ss:$8 sps:$4 sm:$0xff]   ;;  %v1390_v36 = vld [vmem:[#allocation3 + $0xc0] ss:$8 sps:$4 sm:$0xff]   ;;  %v1375_v38 = vld [vmem:[#allocation3 + $0x50] ss:$8 sps:$4 sm:$0xff]  }
  0x35   :  { %v1391_v37 = vld [vmem:[#allocation3 + $0xd4] ss:$8 sps:$4 sm:$0xff]   ;;  %v1379_v39 = vld [vmem:[#allocation3 + $0x64] ss:$8 sps:$4 sm:$0xff]   ;;  %v1393_v40 = vld [vmem:[#allocation3 + $0xd0] ss:$8 sps:$4 sm:$0xff]  }
  0x36   :  { %1207 = vmatpush3.bf16.msra.mxu0 %v1343_v7  ;;  %1323 = vmatpush3.bf16.msra.mxu1 %v1343_v7  ;;  %v1394_v41 = vld [vmem:[#allocation3 + $0xe4] ss:$8 sps:$4 sm:$0xff]   ;;  %v1381_v42 = vld [vmem:[#allocation3 + $0x60] ss:$8 sps:$4 sm:$0xff]   ;;  %v1385_v43 = vld [vmem:[#allocation3 + $0x74] ss:$8 sps:$4 sm:$0xff]  }
  0x37   :  { %1208 = vmatprep.subr.bf16.mxu0 %v1344_v8  ;;  %1316 = vmatprep.subr.bf16.mxu1 %v1344_v8  ;;  %v1396_v44 = vld [vmem:[#allocation3 + $0xe0] ss:$8 sps:$4 sm:$0xff]   ;;  %v1397_v45 = vld [vmem:[#allocation3 + $0xf4] ss:$8 sps:$4 sm:$0xff]   ;;  %v1387_v46 = vld [vmem:[#allocation3 + $0x70] ss:$8 sps:$4 sm:$0xff]  }
  0x38   :  { %v1399_v47 = vld [vmem:[#allocation3 + $0xf0] ss:$8 sps:$4 sm:$0xff]  }
  0x3a   :  { %1209 = vmatpush3.bf16.msra.mxu0 %v1345_v9  ;;  %1324 = vmatpush3.bf16.msra.mxu1 %v1345_v9 }
  0x3b   :  { %1210 = vmatprep.subr.bf16.mxu0 %v1346_v10  ;;  %1317 = vmatprep.subr.bf16.mxu1 %v1346_v10 }
  0x3e   :  { %1211 = vmatpush3.bf16.msra.mxu0 %v1347_v12  ;;  %1325 = vmatpush3.bf16.msra.mxu1 %v1347_v12 }
  0x3f   :  { %1212 = vmatprep.subr.bf16.mxu0 %v1348_v13  ;;  %1318 = vmatprep.subr.bf16.mxu1 %v1348_v13 }
  0x42   :  { %1213 = vmatpush3.bf16.msra.mxu0 %v1349_v15  ;;  %1326 = vmatpush3.bf16.msra.mxu1 %v1349_v15 }
  0x43   :  { %1214 = vmatprep.subr.bf16.mxu0 %v1350_v16  ;;  %1319 = vmatprep.subr.bf16.mxu1 %v1350_v16 }
  0x46   :  { %1215 = vmatpush3.bf16.msra.mxu0 %v1351_v17  ;;  %1327 = vmatpush3.bf16.msra.mxu1 %v1351_v17 }
  0x49   :  { %465 = vmatmul.mubr.bf16.vlgmr.msra.gmra.mrb[0].mxu0 %v1352_v18  ;;  %529 = vmatmul.mubr.bf16.vlgmr.msra.gmra.mrb[0].mxu1 %v1364_v20 }
  0x4a   :  { %472 = vmatprep.mubr.bf16.mxu0 %v1355_v19  ;;  %536 = vmatprep.mubr.bf16.mxu1 %v1370_v21 }
  0x51   :  { %473 = vmatmul.mubr.bf16.gmra.mrb[4].mxu0 %v1357_v22  ;;  %537 = vmatmul.mubr.bf16.gmra.mrb[4].mxu1 %v1372_v24 }
  0x52   :  { %480 = vmatprep.mubr.bf16.mxu0 %v1358_v23  ;;  %544 = vmatprep.mubr.bf16.mxu1 %v1376_v25 }
  0x59   :  { %481 = vmatmul.mubr.bf16.gmra.mrb[8].mxu0 %v1360_v26  ;;  %545 = vmatmul.mubr.bf16.gmra.mrb[8].mxu1 %v1378_v28 }
  0x5a   :  { %488 = vmatprep.mubr.bf16.mxu0 %v1361_v27  ;;  %552 = vmatprep.mubr.bf16.mxu1 %v1382_v29 }
  0x61   :  { %489 = vmatmul.mubr.bf16.gmra.mrb[12].mxu0 %v1363_v30  ;;  %553 = vmatmul.mubr.bf16.gmra.mrb[12].mxu1 %v1384_v32 }
  0x62   :  { %496 = vmatprep.mubr.bf16.mxu0 %v1367_v31  ;;  %560 = vmatprep.mubr.bf16.mxu1 %v1388_v33 }
  0x69   :  { %497 = vmatmul.mubr.bf16.gmra.mrb[16].mxu0 %v1369_v34  ;;  %561 = vmatmul.mubr.bf16.gmra.mrb[16].mxu1 %v1390_v36 }
  0x6a   :  { %504 = vmatprep.mubr.bf16.mxu0 %v1373_v35  ;;  %568 = vmatprep.mubr.bf16.mxu1 %v1391_v37 }
  0x71   :  { %505 = vmatmul.mubr.bf16.gmra.mrb[20].mxu0 %v1375_v38  ;;  %569 = vmatmul.mubr.bf16.gmra.mrb[20].mxu1 %v1393_v40 }
  0x72   :  { %512 = vmatprep.mubr.bf16.mxu0 %v1379_v39  ;;  %576 = vmatprep.mubr.bf16.mxu1 %v1394_v41 }
  0x79   :  { %513 = vmatmul.mubr.bf16.gmra.mrb[24].mxu0 %v1381_v42  ;;  %577 = vmatmul.mubr.bf16.gmra.mrb[24].mxu1 %v1396_v44 }
  0x7a   :  { %520 = vmatprep.mubr.bf16.mxu0 %v1385_v43  ;;  %584 = vmatprep.mubr.bf16.mxu1 %v1397_v45 }
  0x81   :  { %521 = vmatmul.mubr.bf16.gmra.mrb[28].mxu0 %v1387_v46  ;;  %585 = vmatmul.mubr.bf16.gmra.mrb[28].mxu1 %v1399_v47 }
 0x11c   :  { %v1216_v48 = vpop.f32.mrb[0].mxu0  ;;  %v1264_v50 = vpop.f32.mrb[0].mxu1 }
 0x11d   :  { %v1217_v49 = vpop.f32.mrb[1].mxu0  ;;  %v1265_v53 = vpop.f32.mrb[1].mxu1 }
 0x11e   :  { %v1218_v51 = vadd.f32 %v1217_v49, %v1216_v48  ;;  %v1219_v52 = vpop.f32.mrb[2].mxu0  ;;  %v1551_v55 = vadd.f32 %v1265_v53, %v1264_v50  ;;  %v1267_v56 = vpop.f32.mrb[2].mxu1 }
 0x11f   :  { %v1220_v54 = vpop.f32.mrb[3].mxu0  ;;  %v1268_v58 = vpop.f32.mrb[3].mxu1 }
 0x120   :  { %v1221_v57 = vadd.f32 %v1220_v54, %v1219_v52  ;;  %v1553_v59 = vadd.f32 %v1268_v58, %v1267_v56  ;;  %v889_v60 = vmul.f32 %v1218_v51, %v1218_v51 }
 0x122   :  { %v1108_v61 = vpack.c.bf16 %v1221_v57, %v1218_v51  ;;  %v852_v62 = vadd.f32 %v1221_v57, %v1218_v51  ;;  %v890_v63 = vmul.f32 %v1221_v57, %v1221_v57  ;;  %v1148_v0 = vpack.c.bf16 %v1553_v59, %v1551_v55 }
 0x124   :  { %1109 = vst [vmem:[#allocation8] sm:$0xff] %v1108_v61   ;;  %v921_v1 = vadd.f32 %v890_v63, %v889_v60  ;;  %v1222_v2 = vpop.f32.mrb[4].mxu0  ;;  %1192 = vst [vmem:[#allocation8 + $0x40] sm:$0xff] %v1148_v0   ;;  %v1270_v4 = vpop.f32.mrb[4].mxu1 }
 0x125   :  { %v1223_v3 = vpop.f32.mrb[5].mxu0  ;;  %v1271_v7 = vpop.f32.mrb[5].mxu1 }
 0x126   :  { %v1224_v5 = vadd.f32 %v1223_v3, %v1222_v2  ;;  %v1225_v6 = vpop.f32.mrb[6].mxu0  ;;  %v1557_v9 = vadd.f32 %v1271_v7, %v1270_v4  ;;  %v1273_v10 = vpop.f32.mrb[6].mxu1 }
 0x127   :  { %v1226_v8 = vpop.f32.mrb[7].mxu0  ;;  %v1274_v14 = vpop.f32.mrb[7].mxu1 }
 0x128   :  { %v853_v11 = vadd.f32 %v1224_v5, %v852_v62  ;;  %v891_v12 = vmul.f32 %v1224_v5, %v1224_v5  ;;  %v1227_v13 = vadd.f32 %v1226_v8, %v1225_v6  ;;  %v1559_v15 = vadd.f32 %v1274_v14, %v1273_v10 }
 0x12a   :  { %v922_v16 = vadd.f32 %v921_v1, %v891_v12  ;;  %v1113_v17 = vpack.c.bf16 %v1227_v13, %v1224_v5  ;;  %v854_v18 = vadd.f32 %v1227_v13, %v853_v11  ;;  %v892_v19 = vmul.f32 %v1227_v13, %v1227_v13 }
 0x12b   :  { %v1153_v20 = vpack.c.bf16 %v1559_v15, %v1557_v9 }
 0x12c   :  { %1185 = vst [vmem:[#allocation8 + $0x8] sm:$0xff] %v1113_v17   ;;  %v923_v21 = vadd.f32 %v922_v16, %v892_v19  ;;  %v1228_v22 = vpop.f32.mrb[8].mxu0  ;;  %v1276_v24 = vpop.f32.mrb[8].mxu1 }
 0x12d   :  { %v1229_v23 = vpop.f32.mrb[9].mxu0  ;;  %1193 = vst [vmem:[#allocation8 + $0x48] sm:$0xff] %v1153_v20   ;;  %v1277_v27 = vpop.f32.mrb[9].mxu1 }
 0x12e   :  { %v1230_v25 = vadd.f32 %v1229_v23, %v1228_v22  ;;  %v1231_v26 = vpop.f32.mrb[10].mxu0  ;;  %v1563_v29 = vadd.f32 %v1277_v27, %v1276_v24  ;;  %v1279_v30 = vpop.f32.mrb[10].mxu1 }
 0x12f   :  { %v1232_v28 = vpop.f32.mrb[11].mxu0  ;;  %v1280_v34 = vpop.f32.mrb[11].mxu1 }
 0x130   :  { %v855_v31 = vadd.f32 %v1230_v25, %v854_v18  ;;  %v893_v32 = vmul.f32 %v1230_v25, %v1230_v25  ;;  %v1233_v33 = vadd.f32 %v1232_v28, %v1231_v26  ;;  %v1565_v35 = vadd.f32 %v1280_v34, %v1279_v30 }
 0x132   :  { %v924_v36 = vadd.f32 %v923_v21, %v893_v32  ;;  %v1118_v37 = vpack.c.bf16 %v1233_v33, %v1230_v25  ;;  %v856_v38 = vadd.f32 %v1233_v33, %v855_v31  ;;  %v894_v39 = vmul.f32 %v1233_v33, %v1233_v33 }
 0x133   :  { %v1158_v40 = vpack.c.bf16 %v1565_v35, %v1563_v29 }
 0x134   :  { %1186 = vst [vmem:[#allocation8 + $0x10] sm:$0xff] %v1118_v37   ;;  %v925_v41 = vadd.f32 %v924_v36, %v894_v39  ;;  %v1234_v42 = vpop.f32.mrb[12].mxu0  ;;  %v1282_v44 = vpop.f32.mrb[12].mxu1 }
 0x135   :  { %v1235_v43 = vpop.f32.mrb[13].mxu0  ;;  %1194 = vst [vmem:[#allocation8 + $0x50] sm:$0xff] %v1158_v40   ;;  %v1283_v47 = vpop.f32.mrb[13].mxu1 }
 0x136   :  { %v1236_v45 = vadd.f32 %v1235_v43, %v1234_v42  ;;  %v1237_v46 = vpop.f32.mrb[14].mxu0  ;;  %v1569_v49 = vadd.f32 %v1283_v47, %v1282_v44  ;;  %v1285_v50 = vpop.f32.mrb[14].mxu1 }
 0x137   :  { %v1238_v48 = vpop.f32.mrb[15].mxu0  ;;  %v1286_v54 = vpop.f32.mrb[15].mxu1 }
 0x138   :  { %v857_v51 = vadd.f32 %v1236_v45, %v856_v38  ;;  %v895_v52 = vmul.f32 %v1236_v45, %v1236_v45  ;;  %v1239_v53 = vadd.f32 %v1238_v48, %v1237_v46  ;;  %v1571_v56 = vadd.f32 %v1286_v54, %v1285_v50 }
 0x13a   :  { %v926_v57 = vadd.f32 %v925_v41, %v895_v52  ;;  %v1123_v58 = vpack.c.bf16 %v1239_v53, %v1236_v45  ;;  %v858_v60 = vadd.f32 %v1239_v53, %v857_v51  ;;  %v896_v61 = vmul.f32 %v1239_v53, %v1239_v53 }
 0x13b   :  { %v1163_v62 = vpack.c.bf16 %v1571_v56, %v1569_v49 }
 0x13c   :  { %1187 = vst [vmem:[#allocation8 + $0x18] sm:$0xff] %v1123_v58   ;;  %v927_v63 = vadd.f32 %v926_v57, %v896_v61  ;;  %v1240_v0 = vpop.f32.mrb[16].mxu0  ;;  %v1288_v2 = vpop.f32.mrb[16].mxu1 }
 0x13d   :  { %v1241_v1 = vpop.f32.mrb[17].mxu0  ;;  %1195 = vst [vmem:[#allocation8 + $0x58] sm:$0xff] %v1163_v62   ;;  %v1289_v5 = vpop.f32.mrb[17].mxu1 }
 0x13e   :  { %v1242_v3 = vadd.f32 %v1241_v1, %v1240_v0  ;;  %v1243_v4 = vpop.f32.mrb[18].mxu0  ;;  %v1575_v7 = vadd.f32 %v1289_v5, %v1288_v2  ;;  %v1291_v8 = vpop.f32.mrb[18].mxu1 }
 0x13f   :  { %v1244_v6 = vpop.f32.mrb[19].mxu0  ;;  %v1292_v13 = vpop.f32.mrb[19].mxu1 }
 0x140   :  { %v859_v10 = vadd.f32 %v1242_v3, %v858_v60  ;;  %v897_v11 = vmul.f32 %v1242_v3, %v1242_v3  ;;  %v1245_v12 = vadd.f32 %v1244_v6, %v1243_v4  ;;  %v1577_v14 = vadd.f32 %v1292_v13, %v1291_v8 }
 0x142   :  { %v928_v16 = vadd.f32 %v927_v63, %v897_v11  ;;  %v1128_v17 = vpack.c.bf16 %v1245_v12, %v1242_v3  ;;  %v860_v18 = vadd.f32 %v1245_v12, %v859_v10  ;;  %v898_v19 = vmul.f32 %v1245_v12, %v1245_v12 }
 0x143   :  { %v1168_v20 = vpack.c.bf16 %v1577_v14, %v1575_v7 }
 0x144   :  { %1188 = vst [vmem:[#allocation8 + $0x20] sm:$0xff] %v1128_v17   ;;  %v929_v21 = vadd.f32 %v928_v16, %v898_v19  ;;  %v1246_v22 = vpop.f32.mrb[20].mxu0  ;;  %v1294_v24 = vpop.f32.mrb[20].mxu1 }
 0x145   :  { %v1247_v23 = vpop.f32.mrb[21].mxu0  ;;  %1196 = vst [vmem:[#allocation8 + $0x60] sm:$0xff] %v1168_v20   ;;  %v1295_v27 = vpop.f32.mrb[21].mxu1 }
 0x146   :  { %v1248_v25 = vadd.f32 %v1247_v23, %v1246_v22  ;;  %v1249_v26 = vpop.f32.mrb[22].mxu0  ;;  %v1581_v30 = vadd.f32 %v1295_v27, %v1294_v24  ;;  %v1297_v31 = vpop.f32.mrb[22].mxu1  ;;  %v905_v27 = vmul.f32 %v1551_v55, %v1551_v55 }
 0x147   :  { %v1250_v28 = vpop.f32.mrb[23].mxu0  ;;  %v1298_v36 = vpop.f32.mrb[23].mxu1 }
 0x148   :  { %v861_v32 = vadd.f32 %v1248_v25, %v860_v18  ;;  %v899_v33 = vmul.f32 %v1248_v25, %v1248_v25  ;;  %v1251_v34 = vadd.f32 %v1250_v28, %v1249_v26  ;;  %v1583_v37 = vadd.f32 %v1298_v36, %v1297_v31 }
 0x14a   :  { %v930_v38 = vadd.f32 %v929_v21, %v899_v33  ;;  %v1133_v39 = vpack.c.bf16 %v1251_v34, %v1248_v25  ;;  %v862_v40 = vadd.f32 %v1251_v34, %v861_v32  ;;  %v900_v41 = vmul.f32 %v1251_v34, %v1251_v34 }
 0x14b   :  { %v1173_v42 = vpack.c.bf16 %v1583_v37, %v1581_v30  ;;  %v906_v32 = vmul.f32 %v1553_v59, %v1553_v59 }
 0x14c   :  { %1189 = vst [vmem:[#allocation8 + $0x28] sm:$0xff] %v1133_v39   ;;  %v931_v43 = vadd.f32 %v930_v38, %v900_v41  ;;  %v1252_v44 = vpop.f32.mrb[24].mxu0  ;;  %v1300_v46 = vpop.f32.mrb[24].mxu1 }
 0x14d   :  { %v1253_v45 = vpop.f32.mrb[25].mxu0  ;;  %1197 = vst [vmem:[#allocation8 + $0x68] sm:$0xff] %v1173_v42   ;;  %v1301_v50 = vpop.f32.mrb[25].mxu1 }
 0x14e   :  { %v1254_v47 = vadd.f32 %v1253_v45, %v1252_v44  ;;  %v1255_v48 = vpop.f32.mrb[26].mxu0  ;;  %v1587_v52 = vadd.f32 %v1301_v50, %v1300_v46  ;;  %v1303_v53 = vpop.f32.mrb[26].mxu1 }
 0x14f   :  { %v1256_v51 = vpop.f32.mrb[27].mxu0  ;;  %v1304_v60 = vpop.f32.mrb[27].mxu1 }
 0x150   :  { %v863_v54 = vadd.f32 %v1254_v47, %v862_v40  ;;  %v901_v57 = vmul.f32 %v1254_v47, %v1254_v47  ;;  %v1257_v58 = vadd.f32 %v1256_v51, %v1255_v48  ;;  %v1589_v61 = vadd.f32 %v1304_v60, %v1303_v53 }
 0x152   :  { %v932_v62 = vadd.f32 %v931_v43, %v901_v57  ;;  %v1138_v63 = vpack.c.bf16 %v1257_v58, %v1254_v47  ;;  %v864_v0 = vadd.f32 %v1257_v58, %v863_v54  ;;  %v902_v1 = vmul.f32 %v1257_v58, %v1257_v58 }
 0x153   :  { %v1178_v2 = vpack.c.bf16 %v1589_v61, %v1587_v52 }
 0x154   :  { %1190 = vst [vmem:[#allocation8 + $0x30] sm:$0xff] %v1138_v63   ;;  %v933_v3 = vadd.f32 %v932_v62, %v902_v1  ;;  %v1258_v4 = vpop.f32.mrb[28].mxu0  ;;  %v1306_v6 = vpop.f32.mrb[28].mxu1 }
 0x155   :  { %v1259_v5 = vpop.f32.mrb[29].mxu0  ;;  %1198 = vst [vmem:[#allocation8 + $0x70] sm:$0xff] %v1178_v2   ;;  %v1307_v11 = vpop.f32.mrb[29].mxu1 }
 0x156   :  { %v1260_v8 = vadd.f32 %v1259_v5, %v1258_v4  ;;  %v1261_v10 = vpop.f32.mrb[30].mxu0  ;;  %v1593_v13 = vadd.f32 %v1307_v11, %v1306_v6  ;;  %v1309_v16 = vpop.f32.mrb[30].mxu1 }
 0x157   :  { %v1262_v12 = vpop.f32.mrb[31].mxu0  ;;  %v1310_v20 = vpop.f32.mrb[31].mxu1 }
 0x158   :  { %v865_v17 = vadd.f32 %v1260_v8, %v864_v0  ;;  %v903_v18 = vmul.f32 %v1260_v8, %v1260_v8  ;;  %v1263_v19 = vadd.f32 %v1262_v12, %v1261_v10  ;;  %v1595_v21 = vadd.f32 %v1310_v20, %v1309_v16 }
 0x15a   :  { %v934_v22 = vadd.f32 %v933_v3, %v903_v18  ;;  %v1143_v23 = vpack.c.bf16 %v1263_v19, %v1260_v8  ;;  %v866_v24 = vadd.f32 %v1263_v19, %v865_v17  ;;  %v904_v25 = vmul.f32 %v1263_v19, %v1263_v19 }
 0x15b   :  { %v1183_v26 = vpack.c.bf16 %v1595_v21, %v1593_v13 }
 0x15c   :  { %1191 = vst [vmem:[#allocation8 + $0x38] sm:$0xff] %v1143_v23   ;;  %v867_v28 = vadd.f32 %v1551_v55, %v866_v24  ;;  %v935_v31 = vadd.f32 %v934_v22, %v904_v25 }
 0x15d   :  { %1199 = vst [vmem:[#allocation8 + $0x78] sm:$0xff] %v1183_v26  }
 0x15e   :  { %v868_v33 = vadd.f32 %v1553_v59, %v867_v28  ;;  %v936_v34 = vadd.f32 %v935_v31, %v905_v27 }
 0x15f   :  { %1455 = shalt.err (!%p1452_p6)
}
 0x160   :  { %s1456_s16 = scalar_lea.hbm %s1676_s2, 2048 }
 0x161   :  { %p1457_p7 = scmp.ne.s32.totalorder %s1676_s2, %s1456_s16  ;;  %p1460_p8 = scmp.lt.u32.totalorder %s1456_s16, %s1676_s2 }
 0x163   :  { %p1462_p9 = pnand %p1460_p8, %p1457_p7 }
 0x165   :  { %1465 = shalt.err (!%p1462_p9)
}
 0x166   :  { %972 = dma.vmem_to_hbm [thread:$0]  %s967_s12, 2048, %s1676_s2, [#allocation5], %s1500_s0, %s1500_s0, %s1501_s9   ;;  %v907_v55 = vmul.f32 %v1557_v9, %v1557_v9  ;;  %v869_v59 = vadd.f32 %v1557_v9, %v868_v33  ;;  %v937_v36 = vadd.f32 %v936_v34, %v906_v32  ;;  %v908_v38 = vmul.f32 %v1559_v15, %v1559_v15 }
 0x167   :  { %v909_v41 = vmul.f32 %v1563_v29, %v1563_v29  ;;  %v910_v44 = vmul.f32 %v1565_v35, %v1565_v35  ;;  %v911_v9 = vmul.f32 %v1569_v49, %v1569_v49  ;;  %v913_v53 = vmul.f32 %v1575_v7, %v1575_v7  ;;  %s1503_s2 = smov [#allocation9]  }
 0x168   :  { %v870_v39 = vadd.f32 %v1559_v15, %v869_v59  ;;  %v938_v40 = vadd.f32 %v937_v36, %v907_v55  ;;  %v912_v15 = vmul.f32 %v1571_v56, %v1571_v56  ;;  %v914_v58 = vmul.f32 %v1577_v14, %v1577_v14  ;;  %s979_s23 = sshll.u32 %s1503_s2, 4  ;;  %s980_s23 = int_to_ptr.vmem [resolvable:$true] %s979_s23 }
 0x169   :  { %v915_v62 = vmul.f32 %v1581_v30, %v1581_v30  ;;  %v916_v0 = vmul.f32 %v1583_v37, %v1583_v37  ;;  %v917_v2 = vmul.f32 %v1587_v52, %v1587_v52  ;;  %v918_v4 = vmul.f32 %v1589_v61, %v1589_v61  ;;  %s1466_s24 = scalar_lea.vmem %s980_s23, 32  ;;  %p1471_p11 = scmp.lt.s32.totalorder %s980_s23, %s980_s23 }
 0x16a   :  { %v939_v42 = vadd.f32 %v938_v40, %v908_v38  ;;  %v871_v43 = vadd.f32 %v1563_v29, %v870_v39  ;;  %v920_v10 = vmul.f32 %v1595_v21, %v1595_v21  ;;  %vm958_vm0 = vcmask 1040384   ;;  %p1467_p10 = scmp.ne.s32.totalorder %s980_s23, %s1466_s24  ;;  %p1472_p12 = scmp.lt.s32.totalorder %s1466_s24, %s1466_s24 }
 0x16c   :  { %v872_v45 = vadd.f32 %v1565_v35, %v871_v43  ;;  %v940_v46 = vadd.f32 %v939_v42, %v909_v41  ;;  %p1473_p13 = por %p1472_p12, %p1471_p11 }
 0x16e   :  { %v873_v47 = vadd.f32 %v1569_v49, %v872_v45  ;;  %v941_v48 = vadd.f32 %v940_v46, %v910_v44  ;;  %p1474_p0 = pnand %p1473_p13, %p1467_p10 }
 0x170   :  { %v874_v50 = vadd.f32 %v1571_v56, %v873_v47  ;;  %v942_v51 = vadd.f32 %v941_v48, %v911_v9 }
 0x172   :  { %v875_v29 = vadd.f32 %v1575_v7, %v874_v50  ;;  %v943_v54 = vadd.f32 %v942_v51, %v912_v15 }
 0x174   :  { %v944_v35 = vadd.f32 %v943_v54, %v913_v53  ;;  %v876_v57 = vadd.f32 %v1577_v14, %v875_v29 }
 0x176   :  { %v945_v49 = vadd.f32 %v944_v35, %v914_v58  ;;  %v877_v60 = vadd.f32 %v1581_v30, %v876_v57  ;;  %v919_v30 = vmul.f32 %v1593_v13, %v1593_v13 }
 0x178   :  { %v946_v56 = vadd.f32 %v945_v49, %v915_v62  ;;  %v878_v63 = vadd.f32 %v1583_v37, %v877_v60 }
 0x17a   :  { %v947_v7 = vadd.f32 %v946_v56, %v916_v0  ;;  %v879_v1 = vadd.f32 %v1587_v52, %v878_v63 }
 0x17c   :  { %v948_v3 = vadd.f32 %v947_v7, %v917_v2  ;;  %v880_v14 = vadd.f32 %v1589_v61, %v879_v1 }
 0x17e   :  { %v949_v5 = vadd.f32 %v948_v3, %v918_v4  ;;  %v881_v6 = vadd.f32 %v1593_v13, %v880_v14 }
 0x180   :  { %v950_v8 = vadd.f32 %v949_v5, %v919_v30  ;;  %v882_v37 = vadd.f32 %v1595_v21, %v881_v6 }
 0x182   :  { %v883_v11 = vrot.slane %v882_v37, 4  ;;  %v951_v52 = vadd.f32 %v950_v8, %v920_v10 }
 0x184   :  { %v884_v12 = vadd.f32 %v883_v11, %v882_v37  ;;  %v952_v16 = vrot.slane %v951_v52, 4 }
 0x186   :  { %v885_v17 = vrot.slane %v884_v12, 2  ;;  %v953_v18 = vadd.f32 %v952_v16, %v951_v52 }
 0x188   :  { %v886_v19 = vadd.f32 %v885_v17, %v884_v12  ;;  %v954_v61 = vrot.slane %v953_v18, 2 }
 0x18a   :  { %v887_v20 = vrot.slane %v886_v19, 1  ;;  %v955_v22 = vadd.f32 %v954_v61, %v953_v18 }
 0x18c   :  { %v956_v23 = vrot.slane %v955_v22, 1  ;;  %v888_v13 = vadd.f32 %v887_v20, %v886_v19 }
 0x18e   :  { %v957_v24 = vadd.f32 %v956_v23, %v955_v22 }
 0x190   :  { %v959_v25 = vsel %vm958_vm0, %v888_v13, %v957_v24 }
 0x191   :  { %960 = vst [vmem:[#allocation9] sm:$0x3] %v959_v25 }
 0x192   :  { %1477 = shalt.err (!%p1474_p0)
}
 0x193   :  { %s1478_s27 = scalar_lea.hbm %s1677_s3, 32 }
 0x194   :  { %p1479_p1 = scmp.ne.s32.totalorder %s1677_s3, %s1478_s27  ;;  %p1482_p2 = scmp.lt.u32.totalorder %s1478_s27, %s1677_s3 }
 0x196   :  { %p1484_p3 = pnand %p1482_p2, %p1479_p1 }
 0x198   :  { %1487 = shalt.err (!%p1484_p3)
}
 0x199   :  { %982 = dma.vmem_to_hbm [thread:$0]  %s980_s23, 32, %s1677_s3, [#allocation10]  }
 0x19a   :  { %1492 = dma.done.wait [#allocation5], 2048  }
 0x19b   :  { %1493 = vsyncadd [#allocation5], 4294965248 }
 0x19c   :  { %1494 = dma.done.wait [#allocation10], 32  }
 0x19d   :  { %1495 = vsyncadd [#allocation10], 4294967264 }
 0x19e   :  { %989 = vsyncpa [#allocation4], 1 }
 0x19f   :  { %990 = vsyncpa [#allocation7], 1 }
 0x1a0   :  { %991 = vsyncpa [#allocation5], 1 }
 0x1a1   :  { %992 = vsyncpa [#allocation10], 1 }

</bundles_post_ra>
